<compile_context>
chip_gen: v5e
topology: v5e:2x2
jax: 0.10.0
libtpu: 0.0.40
codegen_flags: <defaults>
</compile_context>

<pallas_src>
import jax
import jax.numpy as jnp
from jax.experimental import pallas as pl
from jax.experimental.pallas import tpu as pltpu

_LANE = 128      # lane width: pad feature (output) dims to multiples of this
_SUBLANE = 8     # sublane width: batch tile must be a multiple of this


def _round_up(n, m):
    return ((n + m - 1) // m) * m


def _policy_kernel(x_ref, w1_ref, b1_ref, w2_ref, b2_ref, w3_ref, b3_ref, out_ref):
    cdt = w1_ref.dtype                       # compute dtype of the MXU inputs
    x = x_ref[...].astype(cdt)                                          # (TM, In)
    h = jnp.dot(x, w1_ref[...], preferred_element_type=jnp.float32) + b1_ref[...]
    h = jnp.maximum(h, 0.0).astype(cdt)      # relu in f32, cast only for MXU feed
    h = jnp.dot(h, w2_ref[...], preferred_element_type=jnp.float32) + b2_ref[...]
    h = jnp.maximum(h, 0.0).astype(cdt)
    y = jnp.dot(h, w3_ref[...], preferred_element_type=jnp.float32) + b3_ref[...]
    out_ref[...] = y.astype(out_ref.dtype)                              # lane-dense store


def prepare_policy_params(params, compute_dtype=jnp.float32):
    """One-time lane padding (+ optional bf16 cast) of the weights.

    Call once at init and reuse the result on every forward call."""
    w1, b1 = params["w1"], params["b1"]
    w2, b2 = params["w2"], params["b2"]
    w3, b3 = params["w3"], params["b3"]
    In, H1 = w1.shape
    H2 = w2.shape[1]
    Out = w3.shape[1]
    H1_p = _round_up(H1, _LANE)
    H2_p = _round_up(H2, _LANE)
    Out_p = _round_up(Out, _LANE)
    # fc1's input dim stays un-padded: x is fed at its native feature width.
    return {
        "w1": jnp.pad(w1, ((0, 0), (0, H1_p - H1))).astype(compute_dtype),
        "b1": jnp.pad(b1, ((0, 0), (0, H1_p - H1))).astype(jnp.float32),
        "w2": jnp.pad(w2, ((0, H1_p - H1), (0, H2_p - H2))).astype(compute_dtype),
        "b2": jnp.pad(b2, ((0, 0), (0, H2_p - H2))).astype(jnp.float32),
        "w3": jnp.pad(w3, ((0, H2_p - H2), (0, Out_p - Out))).astype(compute_dtype),
        "b3": jnp.pad(b3, ((0, 0), (0, Out_p - Out))).astype(jnp.float32),
        "out_dim": Out,
    }


def policy_forward(x, prepped, *, tm_max=1024, min_grid_steps=2, trim_output=True):
    """x: (B, input_size) float32.  prepped: output of prepare_policy_params."""
    w1, b1 = prepped["w1"], prepped["b1"]
    w2, b2 = prepped["w2"], prepped["b2"]
    w3, b3 = prepped["w3"], prepped["b3"]
    Out = prepped["out_dim"]

    B, In = x.shape
    assert In == w1.shape[0], "input feature dim mismatch"
    Out_p = w3.shape[1]

    # Batch tiling: pad batch only to a sublane multiple; then pick an even
    # number of grid steps so (a) per-step overhead is amortized with a big
    # tile, (b) v7x megacore gets >=2 parallel steps, (c) tail waste is at
    # most ~8 rows per step (never a full tm_max of zero rows).
    B8 = _round_up(max(B, 1), _SUBLANE)
    want_steps = max(pl.cdiv(B8, tm_max),
                     min_grid_steps if B8 >= 2 * _SUBLANE else 1)
    TM = _round_up(pl.cdiv(B8, want_steps), _SUBLANE)
    n_steps = pl.cdiv(B8, TM)
    B_p = n_steps * TM

    x_p = x if B_p == B else jnp.pad(x, ((0, B_p - B), (0, 0)))

    def resident(arr):
        # Same (whole-array) block every grid step -> stays resident in VMEM.
        # TODO(synk): pipeline_mode=pl.Buffered(1) would drop the redundant
        # second buffer for these constant-index inputs (~0.2 MiB at H=32).
        nd = arr.ndim
        return pl.BlockSpec(arr.shape, lambda i, _nd=nd: (0,) * _nd)

    out_p = pl.pallas_call(
        _policy_kernel,
        out_shape=jax.ShapeDtypeStruct((B_p, Out_p), jnp.float32),
        grid=(n_steps,),
        in_specs=[
            # Batch-tiled activations; feature dim equals the full array dim
            # (no 128-padding needed on the input side).
            pl.BlockSpec((TM, In), lambda i: (i, 0)),
            resident(w1), resident(b1),
            resident(w2), resident(b2),
            resident(w3), resident(b3),
        ],
        out_specs=pl.BlockSpec((TM, Out_p), lambda i: (i, 0)),
        compiler_params=pltpu.CompilerParams(
            dimension_semantics=("parallel",),        # megacore sharding on v7x
            vmem_limit_bytes=32 * 1024 * 1024,        # keeps large-TM configs OK on v5e
        ),
    )(x_p, w1, b1, w2, b2, w3, b3)

    if trim_output:
        return out_p[:B, :Out]
    return out_p        # padded (B_p, Out_p) — consumers that tolerate padding skip a copy


def init_policy_params(key, input_size, hidden_size, output_size):
    """Deterministic synthetic init (uniform, like PyTorch's default bound)."""
    keys = jax.random.split(key, 6)

    def linear(kw, kb, fan_in, fan_out):
        bound = 1.0 / jnp.sqrt(fan_in)
        # stored as (in, out) = W.T relative to PyTorch's (out, in)
        w = jax.random.uniform(kw, (fan_in, fan_out), jnp.float32, -bound, bound)
        b = jax.random.uniform(kb, (1, fan_out), jnp.float32, -bound, bound)
        return w, b

    w1, b1 = linear(keys[0], keys[1], input_size, hidden_size)
    w2, b2 = linear(keys[2], keys[3], hidden_size, hidden_size)
    w3, b3 = linear(keys[4], keys[5], hidden_size, output_size)
    return {"w1": w1, "b1": b1, "w2": w2, "b2": b2, "w3": w3, "b3": b3}


def _reference(x, params):
    h = jnp.maximum(x @ params["w1"] + params["b1"], 0.0)
    h = jnp.maximum(h @ params["w2"] + params["b2"], 0.0)
    return h @ params["w3"] + params["b3"]


if __name__ == "__main__":
    input_size, hidden_size, output_size = 16, 32, 8

    key = jax.random.PRNGKey(0)
    kx1, kx2, kx3, kp = jax.random.split(key, 4)
    params = init_policy_params(kp, input_size, hidden_size, output_size)

    # f32 compute path — exact against the pure-JAX reference.
    prepped_f32 = prepare_policy_params(params, compute_dtype=jnp.float32)

    # Small-shape check (matches the module's implied usage).
    x1 = jax.random.normal(kx1, (8, input_size), dtype=jnp.float32)
    out1 = jax.block_until_ready(policy_forward(x1, prepped_f32))
    ref1 = _reference(x1, params)
    assert out1.shape == (8, output_size)
    assert jnp.allclose(out1, ref1, atol=1e-5, rtol=1e-5)

    # Ragged-batch check (exercises minimal batch padding + 2-step grid).
    x2 = jax.random.normal(kx2, (13, input_size), dtype=jnp.float32)
    out2 = jax.block_until_ready(policy_forward(x2, prepped_f32))
    ref2 = _reference(x2, params)
    assert out2.shape == (13, output_size)
    assert jnp.allclose(out2, ref2, atol=1e-5, rtol=1e-5)

    # Multi-tile grid check (megacore-friendly split into >=2 steps).
    x3 = jax.random.normal(kx3, (64, input_size), dtype=jnp.float32)
    out3 = jax.block_until_ready(policy_forward(x3, prepped_f32))
    ref3 = _reference(x3, params)
    assert out3.shape == (64, output_size)
    assert jnp.allclose(out3, ref3, atol=1e-5, rtol=1e-5)

    # bf16 MXU-input path (native rate on v6e/v7x); f32 accumulation, so only
    # input-precision error — check with a loose tolerance.
    prepped_bf16 = prepare_policy_params(params, compute_dtype=jnp.bfloat16)
    out_bf = jax.block_until_ready(policy_forward(x3, prepped_bf16))
    assert out_bf.shape == (64, output_size)
    assert jnp.allclose(out_bf, ref3, atol=5e-2, rtol=5e-2)

    print("KERNEL_OK")
</pallas_src>

<mosaic_0001>
module attributes {stable_mosaic.version = 11 : i64} {
  func.func @_policy_kernel(%arg0: i32, %arg1: memref<8x16xf32, #tpu.memory_space<vmem>>, %arg2: memref<16x128xf32, #tpu.memory_space<vmem>>, %arg3: memref<1x128xf32, #tpu.memory_space<vmem>>, %arg4: memref<128x128xf32, #tpu.memory_space<vmem>>, %arg5: memref<1x128xf32, #tpu.memory_space<vmem>>, %arg6: memref<128x128xf32, #tpu.memory_space<vmem>>, %arg7: memref<1x128xf32, #tpu.memory_space<vmem>>, %arg8: memref<8x128xf32, #tpu.memory_space<vmem>>) attributes {dimension_semantics = [#tpu.dimension_semantics<parallel>], iteration_bounds = array<i64: 1>, scalar_prefetch = 0 : i64, scratch_operands = 0 : i64, tpu.core_type = #tpu.core_type<tc>, window_params = [{transform_indices = @transform_0, window_bounds = array<i64: 8, 16>}, {pipeline_mode = #tpu.pipeline_mode<synchronous>, transform_indices = @transform_1, window_bounds = array<i64: 16, 128>}, {pipeline_mode = #tpu.pipeline_mode<synchronous>, transform_indices = @transform_2, window_bounds = array<i64: 1, 128>}, {pipeline_mode = #tpu.pipeline_mode<synchronous>, transform_indices = @transform_3, window_bounds = array<i64: 128, 128>}, {pipeline_mode = #tpu.pipeline_mode<synchronous>, transform_indices = @transform_4, window_bounds = array<i64: 1, 128>}, {pipeline_mode = #tpu.pipeline_mode<synchronous>, transform_indices = @transform_5, window_bounds = array<i64: 128, 128>}, {pipeline_mode = #tpu.pipeline_mode<synchronous>, transform_indices = @transform_6, window_bounds = array<i64: 1, 128>}, {transform_indices = @transform_7, window_bounds = array<i64: 8, 128>}]} {
    %c0 = arith.constant 0 : index
    %c0_0 = arith.constant 0 : index
    %0 = vector.load %arg1[%c0, %c0_0] : memref<8x16xf32, #tpu.memory_space<vmem>>, vector<8x16xf32>
    %c0_1 = arith.constant 0 : index
    %c0_2 = arith.constant 0 : index
    %1 = vector.load %arg2[%c0_1, %c0_2] : memref<16x128xf32, #tpu.memory_space<vmem>>, vector<16x128xf32>
    %cst = arith.constant dense<0.000000e+00> : vector<8x128xf32>
    %2 = tpu.matmul %0, %1, %cst {dimension_numbers = #tpu.dot_dimension_numbers<[1], [0], [0], [1], [0, 0, 1, 1], [], []>} : vector<8x16xf32>, vector<16x128xf32>, vector<8x128xf32> -> vector<8x128xf32>
    %c0_3 = arith.constant 0 : index
    %c0_4 = arith.constant 0 : index
    %3 = vector.load %arg3[%c0_3, %c0_4] : memref<1x128xf32, #tpu.memory_space<vmem>>, vector<1x128xf32>
    %4 = vector.broadcast %3 : vector<1x128xf32> to vector<8x128xf32>
    %5 = arith.addf %2, %4 : vector<8x128xf32>
    %cst_5 = arith.constant 0.000000e+00 : f32
    %6 = vector.broadcast %cst_5 : f32 to vector<8x128xf32>
    %7 = arith.maximumf %5, %6 : vector<8x128xf32>
    %c0_6 = arith.constant 0 : index
    %c0_7 = arith.constant 0 : index
    %8 = vector.load %arg4[%c0_6, %c0_7] : memref<128x128xf32, #tpu.memory_space<vmem>>, vector<128x128xf32>
    %cst_8 = arith.constant dense<0.000000e+00> : vector<8x128xf32>
    %9 = tpu.matmul %7, %8, %cst_8 {dimension_numbers = #tpu.dot_dimension_numbers<[1], [0], [0], [1], [0, 0, 1, 1], [], []>} : vector<8x128xf32>, vector<128x128xf32>, vector<8x128xf32> -> vector<8x128xf32>
    %c0_9 = arith.constant 0 : index
    %c0_10 = arith.constant 0 : index
    %10 = vector.load %arg5[%c0_9, %c0_10] : memref<1x128xf32, #tpu.memory_space<vmem>>, vector<1x128xf32>
    %11 = vector.broadcast %10 : vector<1x128xf32> to vector<8x128xf32>
    %12 = arith.addf %9, %11 : vector<8x128xf32>
    %cst_11 = arith.constant 0.000000e+00 : f32
    %13 = vector.broadcast %cst_11 : f32 to vector<8x128xf32>
    %14 = arith.maximumf %12, %13 : vector<8x128xf32>
    %c0_12 = arith.constant 0 : index
    %c0_13 = arith.constant 0 : index
    %15 = vector.load %arg6[%c0_12, %c0_13] : memref<128x128xf32, #tpu.memory_space<vmem>>, vector<128x128xf32>
    %cst_14 = arith.constant dense<0.000000e+00> : vector<8x128xf32>
    %16 = tpu.matmul %14, %15, %cst_14 {dimension_numbers = #tpu.dot_dimension_numbers<[1], [0], [0], [1], [0, 0, 1, 1], [], []>} : vector<8x128xf32>, vector<128x128xf32>, vector<8x128xf32> -> vector<8x128xf32>
    %c0_15 = arith.constant 0 : index
    %c0_16 = arith.constant 0 : index
    %17 = vector.load %arg7[%c0_15, %c0_16] : memref<1x128xf32, #tpu.memory_space<vmem>>, vector<1x128xf32>
    %18 = vector.broadcast %17 : vector<1x128xf32> to vector<8x128xf32>
    %19 = arith.addf %16, %18 : vector<8x128xf32>
    %c0_17 = arith.constant 0 : index
    %c0_18 = arith.constant 0 : index
    %20 = vector.load %arg8[%c0_17, %c0_18] : memref<8x128xf32, #tpu.memory_space<vmem>>, vector<8x128xf32>
    tpu.vector_store %arg8[%c0_17, %c0_18], %19 {strides = array<i32>} : memref<8x128xf32, #tpu.memory_space<vmem>>, vector<8x128xf32>,
    return
  }
  func.func @transform_0(%arg0: i32) -> (i32, i32) {
    %c0_i32 = arith.constant 0 : i32
    %c0_i32_0 = arith.constant 0 : i32
    return %arg0, %c0_i32 : i32, i32
  }
  func.func @transform_1(%arg0: i32) -> (i32, i32) {
    %c0_i32 = arith.constant 0 : i32
    %c0_i32_0 = arith.constant 0 : i32
    %c0_i32_1 = arith.constant 0 : i32
    return %c0_i32, %c0_i32_0 : i32, i32
  }
  func.func @transform_2(%arg0: i32) -> (i32, i32) {
    %c0_i32 = arith.constant 0 : i32
    %c0_i32_0 = arith.constant 0 : i32
    %c0_i32_1 = arith.constant 0 : i32
    return %c0_i32, %c0_i32_0 : i32, i32
  }
  func.func @transform_3(%arg0: i32) -> (i32, i32) {
    %c0_i32 = arith.constant 0 : i32
    %c0_i32_0 = arith.constant 0 : i32
    %c0_i32_1 = arith.constant 0 : i32
    return %c0_i32, %c0_i32_0 : i32, i32
  }
  func.func @transform_4(%arg0: i32) -> (i32, i32) {
    %c0_i32 = arith.constant 0 : i32
    %c0_i32_0 = arith.constant 0 : i32
    %c0_i32_1 = arith.constant 0 : i32
    return %c0_i32, %c0_i32_0 : i32, i32
  }
  func.func @transform_5(%arg0: i32) -> (i32, i32) {
    %c0_i32 = arith.constant 0 : i32
    %c0_i32_0 = arith.constant 0 : i32
    %c0_i32_1 = arith.constant 0 : i32
    return %c0_i32, %c0_i32_0 : i32, i32
  }
  func.func @transform_6(%arg0: i32) -> (i32, i32) {
    %c0_i32 = arith.constant 0 : i32
    %c0_i32_0 = arith.constant 0 : i32
    %c0_i32_1 = arith.constant 0 : i32
    return %c0_i32, %c0_i32_0 : i32, i32
  }
  func.func @transform_7(%arg0: i32) -> (i32, i32) {
    %c0_i32 = arith.constant 0 : i32
    %c0_i32_0 = arith.constant 0 : i32
    return %arg0, %c0_i32 : i32, i32
  }
}

</mosaic_0001>

<bundles_post_ra>
// kernel: tpu_custom_call.1
= control target key start
LH: loop header
LB: loop body
LE: loop exit
PB: predicated region body
PF: predicated region fallthrough
CT: control target
= control target key end

     0   :  { %12 = vsyncpa [#allocation3], 0  ;;  %s431_s0 = inlined_call_operand.hbm [shape: f32[8,16], index: 0, kind: input, shape index: {}]   ;;  %s432_s1 = inlined_call_operand.hbm [shape: f32[16,128], index: 1, kind: input, shape index: {}]   ;;  %s433_s2 = inlined_call_operand.vmem [shape: f32[1,128], index: 2, kind: input, shape index: {}]   ;;  %s434_s3 = inlined_call_operand.hbm [shape: f32[128,128], index: 3, kind: input, shape index: {}]   ;;  %s435_s4 = inlined_call_operand.vmem [shape: f32[1,128], index: 4, kind: input, shape index: {}]   ;;  %s436_s5 = inlined_call_operand.hbm [shape: f32[128,128], index: 5, kind: input, shape index: {}]   ;;  %s437_s6 = inlined_call_operand.vmem [shape: f32[1,128], index: 6, kind: input, shape index: {}]   ;;  %s438_s7 = inlined_call_operand.hbm [shape: f32[8,128], index: 7, kind: output, shape index: {}]  }
   0x1   :  { %13 = vsyncpa [#allocation6], 0 }
   0x2   :  { %14 = vsyncpa [#allocation9], 0  ;;  %s31_s26 = sshll.u32 %s432_s1, 4  ;;  %s32_s26 = int_to_ptr.hbm [resolvable:$true] %s31_s26 }
   0x3   :  { %15 = vsyncpa [#allocation4], 0  ;;  %s360_s27 = smov [#allocation5]   ;;  %s21_s8 = sshll.u32 %s431_s0, 4  ;;  %s22_s8 = int_to_ptr.hbm [resolvable:$true] %s21_s8 }
   0x4   :  { %s33_s28 = sshll.u32 %s360_s27, 4  ;;  %s361_s9 = smov 128   ;;  %s34_s28 = int_to_ptr.vmem [resolvable:$true] %s33_s28 }
   0x5   :  { %s362_s10 = smov 8   ;;  %s363_s11 = smov [#allocation2]  }
   0x6   :  { %39 = dma.hbm_to_vmem [thread:$0]  %s32_s26, 256, %s34_s28, [#allocation6], %s361_s9, %s361_s9, %s362_s10  }
   0x7   :  { %s23_s12 = sshll.u32 %s363_s11, 4  ;;  %s46_s15 = sshll.u32 %s434_s3, 4  ;;  %s24_s12 = int_to_ptr.vmem [resolvable:$true] %s23_s12  ;;  %s47_s15 = int_to_ptr.hbm [resolvable:$true] %s46_s15 }
   0x8   :  { %26 = dma.hbm_to_vmem [thread:$0]  %s22_s8, 128, %s24_s12, [#allocation3]  }
   0x9   :  { %s61_s17 = sshll.u32 %s436_s5, 4  ;;  %s364_s18 = smov [#allocation7]   ;;  %s62_s17 = int_to_ptr.hbm [resolvable:$true] %s61_s17 }
   0xa   :  { %s48_s19 = sshll.u32 %s364_s18, 4  ;;  %s365_s0 = smov [#allocation8]   ;;  %s49_s19 = int_to_ptr.vmem [resolvable:$true] %s48_s19 }
   0xb   :  { %54 = dma.hbm_to_vmem [thread:$0]  %s47_s15, 2048, %s49_s19, [#allocation6], %s361_s9, %s361_s9, %s362_s10  }
   0xc   :  { %s63_s20 = sshll.u32 %s365_s0, 4  ;;  %s64_s20 = int_to_ptr.vmem [resolvable:$true] %s63_s20 }
   0xd   :  { %69 = dma.hbm_to_vmem [thread:$0]  %s62_s17, 2048, %s64_s20, [#allocation9], %s361_s9, %s361_s9, %s362_s10  }
   0xe   :  { %352 = dma.done.wait [#allocation3], 128  }
   0xf   :  { %353 = vsyncadd [#allocation3], 4294967168 }
  0x10   :  { %354 = dma.done.wait [#allocation6], 2304  }
  0x11   :  { %355 = vsyncadd [#allocation6], 4294964992 }
  0x12   :  { %356 = dma.done.wait [#allocation9], 2048  }
  0x13   :  { %357 = vsyncadd [#allocation9], 4294965248  ;;  %v90_v0 = vld [vmem:[#allocation5 + $0x8] sm:$0xff]  ;;  %v89_v1 = vld [vmem:[#allocation5] sm:$0xff]  ;;  %vm95_vm0 = vcmask 130048   ;;  %s366_s24 = smov [#allocation10]  }
  0x14   :  { %113 = vmatpush.msra.mxu0 %v90_v0  ;;  %v88_v2 = vld [vmem:[#allocation2] sm:$0xff]  ;;  %v135_v3 = vld [vmem:[#allocation7 + $0x78] sm:$0xff]  ;;  %v134_v4 = vld [vmem:[#allocation7 + $0x70] sm:$0xff]  ;;  %s207_s25 = sshll.u32 %s366_s24, 4  ;;  %s209_s28 = sshll.u32 %s438_s7, 4  ;;  %s208_s25 = int_to_ptr.vmem [resolvable:$true] %s207_s25  ;;  %s210_s28 = int_to_ptr.hbm [resolvable:$true] %s209_s28 }
  0x15   :  { %140 = vmatpush.msra.mxu1 %v135_v3  ;;  %v133_v5 = vld [vmem:[#allocation7 + $0x68] sm:$0xff]  ;;  %v132_v6 = vld [vmem:[#allocation7 + $0x60] sm:$0xff]  ;;  %v131_v7 = vld [vmem:[#allocation7 + $0x58] sm:$0xff] }
  0x16   :  { %114 = vmatpush.msra.mxu0 %v89_v1  ;;  %v130_v8 = vld [vmem:[#allocation7 + $0x50] sm:$0xff]  ;;  %v129_v9 = vld [vmem:[#allocation7 + $0x48] sm:$0xff]  ;;  %v128_v10 = vld [vmem:[#allocation7 + $0x40] sm:$0xff] }
  0x17   :  { %221 = vmatmul.msk.f32.vlgmr.msra.gmra.mxu0 %vm95_vm0, %v88_v2  ;;  %141 = vmatpush.msra.mxu1 %v134_v4  ;;  %v127_v11 = vld [vmem:[#allocation7 + $0x38] sm:$0xff]  ;;  %v126_v12 = vld [vmem:[#allocation7 + $0x30] sm:$0xff]  ;;  %v125_v13 = vld [vmem:[#allocation7 + $0x28] sm:$0xff] }
  0x18   :  { %v124_v14 = vld [vmem:[#allocation7 + $0x20] sm:$0xff]  ;;  %v123_v15 = vld [vmem:[#allocation7 + $0x18] sm:$0xff]  ;;  %v122_v16 = vld [vmem:[#allocation7 + $0x10] sm:$0xff] }
  0x19   :  { %142 = vmatpush.msra.mxu1 %v133_v5  ;;  %v121_v17 = vld [vmem:[#allocation7 + $0x8] sm:$0xff]  ;;  %v120_v18 = vld [vmem:[#allocation7] sm:$0xff]  ;;  %v176_v19 = vld [vmem:[#allocation8 + $0x78] sm:$0xff] }
  0x1a   :  { %v175_v20 = vld [vmem:[#allocation8 + $0x70] sm:$0xff]  ;;  %181 = vmatpush.msra.mxu2 %v176_v19  ;;  %v174_v21 = vld [vmem:[#allocation8 + $0x68] sm:$0xff]  ;;  %v173_v22 = vld [vmem:[#allocation8 + $0x60] sm:$0xff] }
  0x1b   :  { %143 = vmatpush.msra.mxu1 %v132_v6  ;;  %v172_v23 = vld [vmem:[#allocation8 + $0x58] sm:$0xff]  ;;  %v171_v24 = vld [vmem:[#allocation8 + $0x50] sm:$0xff]  ;;  %v170_v25 = vld [vmem:[#allocation8 + $0x48] sm:$0xff] }
  0x1c   :  { %182 = vmatpush.msra.mxu2 %v175_v20  ;;  %v169_v26 = vld [vmem:[#allocation8 + $0x40] sm:$0xff]  ;;  %v168_v27 = vld [vmem:[#allocation8 + $0x38] sm:$0xff]  ;;  %v167_v28 = vld [vmem:[#allocation8 + $0x30] sm:$0xff] }
  0x1d   :  { %144 = vmatpush.msra.mxu1 %v131_v7  ;;  %v166_v29 = vld [vmem:[#allocation8 + $0x28] sm:$0xff]  ;;  %v165_v30 = vld [vmem:[#allocation8 + $0x20] sm:$0xff]  ;;  %v164_v31 = vld [vmem:[#allocation8 + $0x18] sm:$0xff] }
  0x1e   :  { %183 = vmatpush.msra.mxu2 %v174_v21  ;;  %v229_v32 = vld [vmem:[%s433_s2] ss:$0 sm:$0xff]  ;;  %v163_v36 = vld [vmem:[#allocation8 + $0x10] sm:$0xff]  ;;  %v161_v38 = vld [vmem:[#allocation8] sm:$0xff] }
  0x1f   :  { %145 = vmatpush.msra.mxu1 %v130_v8  ;;  %v162_v37 = vld [vmem:[#allocation8 + $0x8] sm:$0xff] }
  0x20   :  { %184 = vmatpush.msra.mxu2 %v173_v22  ;;  %v230_v39 = vld [vmem:[%s435_s4] ss:$0 sm:$0xff] }
  0x21   :  { %146 = vmatpush.msra.mxu1 %v129_v9  ;;  %v231_v43 = vld [vmem:[%s437_s6] ss:$0 sm:$0xff] }
  0x22   :  { %185 = vmatpush.msra.mxu2 %v172_v23 }
  0x23   :  { %147 = vmatpush.msra.mxu1 %v128_v10 }
  0x24   :  { %186 = vmatpush.msra.mxu2 %v171_v24 }
  0x25   :  { %148 = vmatpush.msra.mxu1 %v127_v11 }
  0x26   :  { %187 = vmatpush.msra.mxu2 %v170_v25 }
  0x27   :  { %149 = vmatpush.msra.mxu1 %v126_v12 }
  0x28   :  { %188 = vmatpush.msra.mxu2 %v169_v26 }
  0x29   :  { %150 = vmatpush.msra.mxu1 %v125_v13 }
  0x2a   :  { %189 = vmatpush.msra.mxu2 %v168_v27 }
  0x2b   :  { %151 = vmatpush.msra.mxu1 %v124_v14 }
  0x2c   :  { %190 = vmatpush.msra.mxu2 %v167_v28 }
  0x2d   :  { %152 = vmatpush.msra.mxu1 %v123_v15 }
  0x2e   :  { %191 = vmatpush.msra.mxu2 %v166_v29 }
  0x2f   :  { %153 = vmatpush.msra.mxu1 %v122_v16 }
  0x30   :  { %192 = vmatpush.msra.mxu2 %v165_v30 }
  0x31   :  { %154 = vmatpush.msra.mxu1 %v121_v17 }
  0x32   :  { %193 = vmatpush.msra.mxu2 %v164_v31 }
  0x33   :  { %155 = vmatpush.msra.mxu1 %v120_v18 }
  0x34   :  { %194 = vmatpush.msra.mxu2 %v163_v36 }
  0x36   :  { %195 = vmatpush.msra.mxu2 %v162_v37 }
  0x38   :  { %196 = vmatpush.msra.mxu2 %v161_v38 }
  0x94   :  { %v116_v33 = vpop.f32.mrf.mxu0 }
  0x95   :  { %v117_v34 = vadd.f32 %v229_v32, %v116_v33 }
  0x97   :  { %v119_v35 = vmax.f32 %v117_v34, 0.0 }
  0x99   :  { %156 = vmatmul.f32.vlgmr.msra.gmra.mxu1 %v119_v35 }
 0x116   :  { %v157_v40 = vpop.f32.mrf.mxu1 }
 0x117   :  { %v158_v41 = vadd.f32 %v230_v39, %v157_v40 }
 0x119   :  { %v160_v42 = vmax.f32 %v158_v41, 0.0 }
 0x11b   :  { %197 = vmatmul.f32.vlgmr.msra.gmra.mxu2 %v160_v42 }
 0x19e   :  { %v198_v44 = vpop.f32.mrf.mxu2 }
 0x19f   :  { %v199_v45 = vadd.f32 %v231_v43, %v198_v44 }
 0x1a1   :  { %201 = vst [vmem:[#allocation10] sm:$0xff] %v199_v45 }
 0x1a2   :  { %212 = dma.vmem_to_hbm [thread:$0]  %s208_s25, 128, %s210_s28, [#allocation4]  }
 0x1a3   :  { %358 = dma.done.wait [#allocation4], 128  }
 0x1a4   :  { %359 = vsyncadd [#allocation4], 4294967168 }
 0x1a5   :  { %217 = vsyncpa [#allocation3], 1 }
 0x1a6   :  { %218 = vsyncpa [#allocation6], 1 }
 0x1a7   :  { %219 = vsyncpa [#allocation9], 1 }
 0x1a8   :  { %220 = vsyncpa [#allocation4], 1 }

</bundles_post_ra>
